<compile_context>
chip_gen: v7x
topology: tpu7x:2x2x1
jax: 0.10.0
libtpu: 0.0.40
codegen_flags: <defaults>
</compile_context>

<pallas_src>
import functools
import math

import jax
import jax.numpy as jnp
from jax.experimental import pallas as pl
from jax.experimental.pallas import tpu as pltpu


def _gelu_tanh(x):
    # F.gelu(x, approximate='tanh')
    c = math.sqrt(2.0 / math.pi)
    return 0.5 * x * (1.0 + jnp.tanh(c * (x + 0.044715 * x * x * x)))


def _round_up(x, n):
    return ((x + n - 1) // n) * n


def _cdiv(a, b):
    return (a + b - 1) // b


def ffn_kernel(x_ref, w1_ref, b1_ref, w2_ref, b2_ref, o_ref, *scratch,
               n_sub, sub_k, compute_dtype, acc_in_out):
    # x_ref:  (tm, dim_p)        w1_ref: (dim_p, tk)     b1_ref: (1, tk)   [f32]
    # w2_ref: (tk, dim_out_p)    b2_ref: (1, dim_out_p)  [f32]
    # o_ref:  (tm, dim_out_p)    scratch: optional (tm, dim_out_p) f32 acc
    acc_ref = o_ref if acc_in_out else scratch[0]
    k = pl.program_id(1)

    @pl.when(k == 0)
    def _init():
        acc_ref[...] = jnp.zeros_like(acc_ref)

    # Process the tk slab in n_sub sub-chunks (fully unrolled, static slices):
    # the next chunk's fc1 matmul can be scheduled under the previous chunk's
    # VPU/EUP gelu + cast, keeping the MXU busy, and the live f32 intermediate
    # shrinks to (tm, sub_k).
    for j in range(n_sub):
        lo = j * sub_k
        h = jnp.dot(x_ref[...], w1_ref[:, lo:lo + sub_k],
                    preferred_element_type=jnp.float32)
        h = _gelu_tanh(h + b1_ref[:, lo:lo + sub_k].astype(jnp.float32))
        acc_ref[...] += jnp.dot(h.astype(compute_dtype),
                                w2_ref[lo:lo + sub_k, :],
                                preferred_element_type=jnp.float32)

    @pl.when(k == pl.num_programs(1) - 1)
    def _finalize():
        # fc2 bias is added exactly once, at the last reduction step.
        o_ref[...] = (acc_ref[...] + b2_ref[...].astype(jnp.float32)
                      ).astype(o_ref.dtype)


def _pad_cast_2d(a, rows, cols, dtype):
    # Skip pad / cast when they are no-ops (pre-padded / pre-cast weights are
    # passed through with zero extra HBM traffic).
    if a.shape != (rows, cols):
        a = jnp.pad(a, ((0, rows - a.shape[0]), (0, cols - a.shape[1])))
    if a.dtype != dtype:
        a = a.astype(dtype)
    return a


def _pad_cast_bias(b, cols, dtype):
    if b.shape[-1] != cols:
        b = jnp.pad(b, (0, cols - b.shape[-1]))
    b = b.reshape(1, cols)
    if b.dtype != dtype:
        b = b.astype(dtype)
    return b


def feed_forward(hidden_states, w1, b1, w2, b2, *,
                 tm=512, tk=512, compute_dtype=jnp.bfloat16, out_dtype=None):
    """hidden_states: (..., dim) -> (..., dim_out).

    w1: (dim, inner), b1: (inner,), w2: (inner, dim_out), b2: (dim_out,)
    (weights transposed vs. PyTorch so the kernel computes x @ W).
    compute_dtype: dtype fed to the MXU (default bf16); accumulation is f32.
    For hot-loop use, pre-cast (and pre-pad to multiples of 128) the weights —
    the wrapper then performs no per-call copies.
    """
    orig_shape = hidden_states.shape
    dim = orig_shape[-1]
    inner = w1.shape[1]
    dim_out = w2.shape[1]
    out_dtype = jnp.dtype(out_dtype if out_dtype is not None
                          else hidden_states.dtype)
    compute_dtype = jnp.dtype(compute_dtype)

    x = hidden_states.reshape(-1, dim)
    m = x.shape[0]

    # Lane-dense padding targets: every matmul dim a multiple of 128 so all
    # tiles are (8,128)-aligned and output stores are unmasked full-lane vst.
    dim_p = _round_up(dim, 128)
    inner_p = _round_up(inner, 128)
    dim_out_p = _round_up(dim_out, 128)

    # Inner tile: largest multiple of 128 that divides inner_p and is <= the
    # requested tk (avoids re-padding the hidden dim up to a multiple of tk).
    q_total = inner_p // 128
    tk_blocks = max(1, min(tk, inner_p) // 128)
    best = 1
    for d in range(1, q_total + 1):
        if q_total % d == 0 and d <= tk_blocks:
            best = d
    tk = best * 128

    # Token tile: multiple of 8, clamped to the token count, and at least two
    # token tiles whenever possible so the "parallel" axis feeds both v7x
    # TensorCores (also bounds row-padding waste for short sequences).
    tm = max(8, min(_round_up(tm, 8), _round_up(m, 8)))
    if _round_up(m, tm) // tm < 2 and m > 8:
        tm = _round_up(_cdiv(m, 2), 8)

    acc_in_out = (out_dtype == jnp.dtype(jnp.float32))
    cbpe = compute_dtype.itemsize
    obpe = out_dtype.itemsize

    def _vmem_bytes(tm_, tk_):
        return int(2 * tm_ * dim_p * cbpe                 # x tile (2 bufs)
                   + 2 * dim_p * tk_ * cbpe               # w1 tile (2 bufs)
                   + 2 * tk_ * dim_out_p * cbpe           # w2 tile (2 bufs)
                   + 2 * (tk_ + dim_out_p) * 4            # biases (f32)
                   + 2 * tm_ * dim_out_p * obpe           # out tile
                   + (0 if acc_in_out else tm_ * dim_out_p * 4)  # acc scratch
                   + 2 * tm_ * tk_ * 4)                   # f32 intermediate h

    # Per-generation VMEM budget (v5e/v6e ~128 MiB, v7x ~64 MiB per core).
    try:
        vmem_cap = int(pltpu.get_tpu_info().vmem_capacity_bytes)
    except Exception:
        vmem_cap = 64 * 2**20  # conservative: safe on every generation
    usable = vmem_cap * 7 // 8  # leave headroom for Mosaic internal scratch

    # Grow the token tile while the generation's VMEM allows (weight traffic
    # per token tile is fixed, so arithmetic intensity scales ~ tm), keeping
    # at least 2 token tiles.
    while (tm * 2 <= 1024 and tm * 2 <= _round_up(m, 8)
           and _vmem_bytes(tm * 2, tk) <= usable
           and _round_up(m, tm * 2) // (tm * 2) >= 2):
        tm *= 2

    # Shrink tiles if the requested config does not fit this generation.
    while _vmem_bytes(tm, tk) > usable:
        if tk >= 256:
            tk //= 2          # halving keeps tk a divisor of inner_p
        elif tm > 16:
            tm = max(8, _round_up(tm // 2, 8))
        else:
            break

    m_p = _round_up(m, tm)

    # De-serialize fc1 -> gelu -> fc2 inside each tk slab with 2 sub-chunks.
    n_sub = 2 if (tk >= 256 and (tk // 128) % 2 == 0) else 1
    sub_k = tk // n_sub

    # Zero-padding is exact: padded x cols hit zero w1 rows; padded inner cols
    # give gelu(0)=0 against zero w2 rows; padded dim_out cols are sliced off.
    x_p = _pad_cast_2d(x, m_p, dim_p, compute_dtype)
    w1_p = _pad_cast_2d(w1, dim_p, inner_p, compute_dtype)
    w2_p = _pad_cast_2d(w2, inner_p, dim_out_p, compute_dtype)
    b1_p = _pad_cast_bias(b1, inner_p, jnp.float32)
    b2_p = _pad_cast_bias(b2, dim_out_p, jnp.float32)
    # TODO(synk): optional fp8 weight-streaming path for v7x (halves weight HBM
    # traffic when weight-read bound; needs numerics validation).

    grid = (m_p // tm, inner_p // tk)
    n_token_tiles = grid[0]

    est = _vmem_bytes(tm, tk)
    vmem_limit = int(min(max(est * 9 // 8 + 8 * 2**20, 16 * 2**20), usable))

    cost = pl.CostEstimate(
        flops=2 * m_p * dim_p * inner_p + 2 * m_p * inner_p * dim_out_p,
        transcendentals=m_p * inner_p,
        bytes_accessed=(m_p * dim_p * cbpe
                        + n_token_tiles * (dim_p * inner_p
                                           + inner_p * dim_out_p) * cbpe
                        + m_p * dim_out_p * obpe
                        + (inner_p + dim_out_p) * 4))

    kernel = functools.partial(ffn_kernel, n_sub=n_sub, sub_k=sub_k,
                               compute_dtype=compute_dtype,
                               acc_in_out=acc_in_out)

    # When out dtype is f32 the (k-invariant) output block itself is the
    # accumulator — saves tm*dim_out_p*4 bytes of scratch + a full-tile copy.
    scratch_shapes = ([] if acc_in_out
                      else [pltpu.VMEM((tm, dim_out_p), jnp.float32)])

    out = pl.pallas_call(
        kernel,
        out_shape=jax.ShapeDtypeStruct((m_p, dim_out_p), out_dtype),
        grid_spec=pltpu.PrefetchScalarGridSpec(
            num_scalar_prefetch=0,
            grid=grid,
            in_specs=[
                pl.BlockSpec((tm, dim_p), lambda i, k: (i, 0)),        # x
                pl.BlockSpec((dim_p, tk), lambda i, k: (0, k)),        # w1
                pl.BlockSpec((1, tk), lambda i, k: (0, k)),            # b1
                pl.BlockSpec((tk, dim_out_p), lambda i, k: (k, 0)),    # w2
                pl.BlockSpec((1, dim_out_p), lambda i, k: (0, 0)),     # b2
            ],
            out_specs=pl.BlockSpec((tm, dim_out_p), lambda i, k: (i, 0)),
            scratch_shapes=scratch_shapes,
        ),
        compiler_params=pltpu.CompilerParams(
            dimension_semantics=("parallel", "arbitrary"),
            vmem_limit_bytes=vmem_limit,
        ),
        cost_estimate=cost,
    )(x_p, w1_p, b1_p, w2_p, b2_p)

    out = out[:m, :dim_out]
    return out.reshape(*orig_shape[:-1], dim_out)


def init_params(key, dim, inner_dim, dim_out, dtype=jnp.float32):
    # nn.Linear default init: U(-1/sqrt(fan_in), 1/sqrt(fan_in)).
    k1, k2, k3, k4 = jax.random.split(key, 4)
    bound1 = 1.0 / math.sqrt(dim)
    bound2 = 1.0 / math.sqrt(inner_dim)
    # Stored transposed vs. PyTorch: (dim_in, dim_out) so the kernel does x @ W.
    w1 = jax.random.uniform(k1, (dim, inner_dim), dtype, -bound1, bound1)
    b1 = jax.random.uniform(k2, (inner_dim,), dtype, -bound1, bound1)
    w2 = jax.random.uniform(k3, (inner_dim, dim_out), dtype, -bound2, bound2)
    b2 = jax.random.uniform(k4, (dim_out,), dtype, -bound2, bound2)
    return w1, b1, w2, b2


if __name__ == "__main__":
    batch, seq, dim = 2, 8, 32
    mult = 4
    inner_dim = dim * mult        # 128
    dim_out = dim                 # default dim_out = dim

    key = jax.random.PRNGKey(0)
    kx, kp = jax.random.split(key)
    hidden_states = jax.random.normal(kx, (batch, seq, dim), jnp.float32)
    w1, b1, w2, b2 = init_params(kp, dim, inner_dim, dim_out)

    # Reference in plain JAX (same math as the PyTorch forward).
    h_ref = hidden_states.reshape(-1, dim) @ w1 + b1
    h_ref = _gelu_tanh(h_ref)
    o_ref = (h_ref @ w2 + b2).reshape(batch, seq, dim_out)

    # Full-precision MXU path (tight check).
    out = feed_forward(hidden_states, w1, b1, w2, b2,
                       compute_dtype=jnp.float32)
    out = jax.block_until_ready(out)
    assert out.shape == (batch, seq, dim_out)
    assert jnp.allclose(out, o_ref, atol=1e-5, rtol=1e-5)

    # Default path: bf16 into the MXU with pre-cast weights (no per-call cast),
    # f32 accumulation (v6e/v7x roofline path).
    w1_bf = w1.astype(jnp.bfloat16)
    w2_bf = w2.astype(jnp.bfloat16)
    out_bf = feed_forward(hidden_states, w1_bf, b1, w2_bf, b2)
    out_bf = jax.block_until_ready(out_bf)
    assert out_bf.shape == (batch, seq, dim_out)
    assert jnp.allclose(out_bf.astype(jnp.float32), o_ref, atol=5e-2, rtol=5e-2)

    print("KERNEL_OK")
</pallas_src>

<mosaic_0001>
module attributes {stable_mosaic.version = 11 : i64} {
  func.func @ffn_kernel(%arg0: i32, %arg1: i32, %arg2: memref<8x128xf32, #tpu.memory_space<vmem>>, %arg3: memref<128x128xf32, #tpu.memory_space<vmem>>, %arg4: memref<1x128xf32, #tpu.memory_space<vmem>>, %arg5: memref<128x128xf32, #tpu.memory_space<vmem>>, %arg6: memref<1x128xf32, #tpu.memory_space<vmem>>, %arg7: memref<8x128xf32, #tpu.memory_space<vmem>>) attributes {dimension_semantics = [#tpu.dimension_semantics<parallel>, #tpu.dimension_semantics<arbitrary>], iteration_bounds = array<i64: 2, 1>, scalar_prefetch = 0 : i64, scratch_operands = 0 : i64, tpu.core_type = #tpu.core_type<tc>, window_params = [{transform_indices = @transform_0, window_bounds = array<i64: 8, 128>}, {transform_indices = @transform_1, window_bounds = array<i64: 128, 128>}, {transform_indices = @transform_2, window_bounds = array<i64: 1, 128>}, {transform_indices = @transform_3, window_bounds = array<i64: 128, 128>}, {pipeline_mode = #tpu.pipeline_mode<synchronous>, transform_indices = @transform_4, window_bounds = array<i64: 1, 128>}, {transform_indices = @transform_5, window_bounds = array<i64: 8, 128>}]} {
    %c0_i32 = arith.constant 0 : i32
    %0 = arith.cmpi eq, %arg1, %c0_i32 : i32
    %1 = arith.extui %0 : i1 to i32
    %c0_i32_0 = arith.constant 0 : i32
    %2 = arith.cmpi ne, %1, %c0_i32_0 : i32
    scf.if %2 {
      %cst_19 = arith.constant 0.000000e+00 : f32
      %30 = vector.broadcast %cst_19 : f32 to vector<8x128xf32>
      %c0_20 = arith.constant 0 : index
      %c0_21 = arith.constant 0 : index
      %31 = vector.load %arg7[%c0_20, %c0_21] : memref<8x128xf32, #tpu.memory_space<vmem>>, vector<8x128xf32>
      tpu.vector_store %arg7[%c0_20, %c0_21], %30 {strides = array<i32>} : memref<8x128xf32, #tpu.memory_space<vmem>>, vector<8x128xf32>,
    } else {
    }
    %c0 = arith.constant 0 : index
    %c0_1 = arith.constant 0 : index
    %3 = vector.load %arg2[%c0, %c0_1] : memref<8x128xf32, #tpu.memory_space<vmem>>, vector<8x128xf32>
    %c0_2 = arith.constant 0 : index
    %c0_3 = arith.constant 0 : index
    %4 = vector.load %arg3[%c0_2, %c0_3] : memref<128x128xf32, #tpu.memory_space<vmem>>, vector<128x128xf32>
    %cst = arith.constant dense<0.000000e+00> : vector<8x128xf32>
    %5 = tpu.matmul %3, %4, %cst {dimension_numbers = #tpu.dot_dimension_numbers<[1], [0], [0], [1], [0, 0, 1, 1], [], []>} : vector<8x128xf32>, vector<128x128xf32>, vector<8x128xf32> -> vector<8x128xf32>
    %c0_4 = arith.constant 0 : index
    %c0_5 = arith.constant 0 : index
    %6 = vector.load %arg4[%c0_4, %c0_5] : memref<1x128xf32, #tpu.memory_space<vmem>>, vector<1x128xf32>
    %7 = vector.broadcast %6 : vector<1x128xf32> to vector<8x128xf32>
    %8 = arith.addf %5, %7 : vector<8x128xf32>
    %cst_6 = arith.constant 5.000000e-01 : f32
    %9 = vector.broadcast %cst_6 : f32 to vector<8x128xf32>
    %10 = arith.mulf %9, %8 : vector<8x128xf32>
    %cst_7 = arith.constant 4.471500e-02 : f32
    %11 = vector.broadcast %cst_7 : f32 to vector<8x128xf32>
    %12 = arith.mulf %11, %8 : vector<8x128xf32>
    %13 = arith.mulf %12, %8 : vector<8x128xf32>
    %14 = arith.mulf %13, %8 : vector<8x128xf32>
    %15 = arith.addf %8, %14 : vector<8x128xf32>
    %cst_8 = arith.constant 0.797884583 : f32
    %16 = vector.broadcast %cst_8 : f32 to vector<8x128xf32>
    %17 = arith.mulf %16, %15 : vector<8x128xf32>
    %18 = math.tanh %17 : vector<8x128xf32>
    %cst_9 = arith.constant 1.000000e+00 : f32
    %19 = vector.broadcast %cst_9 : f32 to vector<8x128xf32>
    %20 = arith.addf %19, %18 : vector<8x128xf32>
    %21 = arith.mulf %10, %20 : vector<8x128xf32>
    %c0_10 = arith.constant 0 : index
    %c0_11 = arith.constant 0 : index
    %22 = vector.load %arg7[%c0_10, %c0_11] : memref<8x128xf32, #tpu.memory_space<vmem>>, vector<8x128xf32>
    %c0_12 = arith.constant 0 : index
    %c0_13 = arith.constant 0 : index
    %23 = vector.load %arg5[%c0_12, %c0_13] : memref<128x128xf32, #tpu.memory_space<vmem>>, vector<128x128xf32>
    %cst_14 = arith.constant dense<0.000000e+00> : vector<8x128xf32>
    %24 = tpu.matmul %21, %23, %cst_14 {dimension_numbers = #tpu.dot_dimension_numbers<[1], [0], [0], [1], [0, 0, 1, 1], [], []>} : vector<8x128xf32>, vector<128x128xf32>, vector<8x128xf32> -> vector<8x128xf32>
    %25 = arith.addf %22, %24 : vector<8x128xf32>
    %c0_15 = arith.constant 0 : index
    %c0_16 = arith.constant 0 : index
    %26 = vector.load %arg7[%c0_15, %c0_16] : memref<8x128xf32, #tpu.memory_space<vmem>>, vector<8x128xf32>
    tpu.vector_store %arg7[%c0_15, %c0_16], %25 {strides = array<i32>} : memref<8x128xf32, #tpu.memory_space<vmem>>, vector<8x128xf32>,
    %c0_i32_17 = arith.constant 0 : i32
    %27 = arith.cmpi eq, %arg1, %c0_i32_17 : i32
    %28 = arith.extui %27 : i1 to i32
    %c0_i32_18 = arith.constant 0 : i32
    %29 = arith.cmpi ne, %28, %c0_i32_18 : i32
    scf.if %29 {
      %c0_19 = arith.constant 0 : index
      %c0_20 = arith.constant 0 : index
      %30 = vector.load %arg7[%c0_19, %c0_20] : memref<8x128xf32, #tpu.memory_space<vmem>>, vector<8x128xf32>
      %c0_21 = arith.constant 0 : index
      %c0_22 = arith.constant 0 : index
      %31 = vector.load %arg6[%c0_21, %c0_22] : memref<1x128xf32, #tpu.memory_space<vmem>>, vector<1x128xf32>
      %32 = vector.broadcast %31 : vector<1x128xf32> to vector<8x128xf32>
      %33 = arith.addf %30, %32 : vector<8x128xf32>
      %c0_23 = arith.constant 0 : index
      %c0_24 = arith.constant 0 : index
      %34 = vector.load %arg7[%c0_23, %c0_24] : memref<8x128xf32, #tpu.memory_space<vmem>>, vector<8x128xf32>
      tpu.vector_store %arg7[%c0_23, %c0_24], %33 {strides = array<i32>} : memref<8x128xf32, #tpu.memory_space<vmem>>, vector<8x128xf32>,
    } else {
    }
    return
  }
  func.func @transform_0(%arg0: i32, %arg1: i32) -> (i32, i32) {
    %c0_i32 = arith.constant 0 : i32
    %c0_i32_0 = arith.constant 0 : i32
    return %arg0, %c0_i32 : i32, i32
  }
  func.func @transform_1(%arg0: i32, %arg1: i32) -> (i32, i32) {
    %c0_i32 = arith.constant 0 : i32
    %c0_i32_0 = arith.constant 0 : i32
    return %c0_i32, %arg1 : i32, i32
  }
  func.func @transform_2(%arg0: i32, %arg1: i32) -> (i32, i32) {
    %c0_i32 = arith.constant 0 : i32
    %c0_i32_0 = arith.constant 0 : i32
    return %c0_i32, %arg1 : i32, i32
  }
  func.func @transform_3(%arg0: i32, %arg1: i32) -> (i32, i32) {
    %c0_i32 = arith.constant 0 : i32
    %c0_i32_0 = arith.constant 0 : i32
    return %arg1, %c0_i32 : i32, i32
  }
  func.func @transform_4(%arg0: i32, %arg1: i32) -> (i32, i32) {
    %c0_i32 = arith.constant 0 : i32
    %c0_i32_0 = arith.constant 0 : i32
    %c0_i32_1 = arith.constant 0 : i32
    return %c0_i32, %c0_i32_0 : i32, i32
  }
  func.func @transform_5(%arg0: i32, %arg1: i32) -> (i32, i32) {
    %c0_i32 = arith.constant 0 : i32
    %c0_i32_0 = arith.constant 0 : i32
    return %arg0, %c0_i32 : i32, i32
  }
}

</mosaic_0001>

<bundles_post_ra>
// kernel: tpu_custom_call.1
= control target key start
LH: loop header
LB: loop body
LE: loop exit
PB: predicated region body
PF: predicated region fallthrough
CT: control target
= control target key end

     0   :  { %10 = vsyncpa [#allocation3], 0  ;;  %s1402_s0 = inlined_call_operand.hbm [shape: f32[16,128], index: 0, kind: input, shape index: {}]   ;;  %s1403_s1 = inlined_call_operand.hbm [shape: f32[128,128], index: 1, kind: input, shape index: {}]   ;;  %s1404_s2 = inlined_call_operand.vmem [shape: f32[1,128], index: 2, kind: input, shape index: {}]   ;;  %s1405_s3 = inlined_call_operand.hbm [shape: f32[128,128], index: 3, kind: input, shape index: {}]   ;;  %s1406_s4 = inlined_call_operand.vmem [shape: f32[1,128], index: 4, kind: input, shape index: {}]   ;;  %s1407_s5 = inlined_call_operand.hbm [shape: f32[16,128], index: 5, kind: output, shape index: {}]  }
   0x1   :  { %12 = vsyncpa [#allocation3 + $0x1], 0 }
   0x2   :  { %13 = vsyncpa [#allocation6], 0 }
   0x3   :  { %14 = vsyncpa [#allocation4], 0 }
   0x4   :  { %16 = vsyncpa [#allocation4 + $0x1], 0  ;;  %s1123_s18 = smov 0   ;;  %s1125_s19 = smov 0  }
   0x5   :  { %s1127_s20 = smov 0   ;;  %s1129_s21 = smov 0  }
   0x6   :  { %s1131_s22 = smov 0   ;;  %s1133_s23 = smov 0  }
   0x7 LB: > { %s648_s24 = sadd.s32 4294967295, %s1082_s23   ;;  %s649_s25 = sadd.s32 4294967294, %s1082_s23   ;;  %s1082_s23 = sphi %s1133_s23, %s22_s23   ;;  %s1078_s22 = sphi %s1131_s22, %s1429_s22   ;;  %s1074_s21 = sphi %s1129_s21, %s1428_s21   ;;  %s1070_s20 = sphi %s1127_s20, %s1427_s20   ;;  %s1066_s19 = sphi %s1125_s19, %s1426_s19   ;;  %s1062_s18 = sphi %s1123_s18, %s1425_s18  }
   0x8   : > { %p54_p0 = scmp.ne.s32.totalorder %s1066_s19, %s1062_s18  ;;  %p1157_p1 = scmp.eq.s32.totalorder %s648_s24, 0 }
   0x9   : > { %p1161_p2 = scmp.eq.s32.totalorder %s648_s24, 1  ;;  %p183_p3 = scmp.eq.s32.totalorder %s649_s25, 1 }
   0xa   : > { %s1412_s26 = scalar_select %p1157_p1, 1, 0 }
   0xb   : > { %p1167_p4 = por %p1157_p1, %p54_p0  ;;  %p650_p5 = scmp.ge.s32.totalorder %s1082_s23, 1 }
   0xc   : > { %p1172_p6 = por %p183_p3, %p54_p0  ;;  %p190_p7 = scmp.lt.s32.totalorder %s1082_s23, 3 }
   0xd   : > { %s1414_s28 = scalar_select %p1167_p4, 1, 0 }
   0xe   : > { %s1415_s29 = scalar_select %p1172_p6, 1, 0 }
   0xf   : > { %p1177_p8 = pnand %p650_p5, %p190_p7  ;;  %s1084_s6 = smov [#allocation5]  }
  0x10   : > { %s204_s7 = sshll.u32 %s1084_s6, 4  ;;  %s1085_s9 = smov [#allocation7]   ;;  %s1181_s7 = int_to_ptr.vmem [resolvable:$true] %s204_s7 }
  0x11   : > { %p832_p9 = pneg %p1177_p8  ;;  %s226_s10 = sshll.u32 %s1085_s9, 4  ;;  %s1192_s10 = int_to_ptr.vmem [resolvable:$true] %s226_s10 }
  0x12   : > { %s910_s13 = scalar_lea.hbm %s1403_s1, 2048 }
  0x13   : > { %p1188_p11 = pnand %p832_p9, %p1157_p1  ;;  %p911_p12 = scmp.ne.s32.totalorder %s1403_s1, %s910_s13 }
  0x14   : > { %p917_p5 = scmp.lt.u32.totalorder %s910_s13, %s1403_s1 }
  0x15   : > { %p912_p13 = pneg %p1188_p11 }
  0x17   : > { %p913_p0 = pnand %p912_p13, %p911_p12 }
  0x19   : > { %p914_p3 = pneg %p913_p0 }
  0x1b   : > { %p919_p7 = pnand %p917_p5, %p914_p3 }
  0x1d   : > { %922 = shalt.err (!%p919_p7)
}
  0x1e   : > { %s923_s24 = scalar_lea.vmem %s1181_s7, 2048  ;;  %p931_p1 = scmp.lt.s32.totalorder %s1181_s7, %s1181_s7 }
  0x1f   : > { %p924_p9 = scmp.ne.s32.totalorder %s1181_s7, %s923_s24  ;;  %p932_p12 = scmp.lt.s32.totalorder %s923_s24, %s923_s24 }
  0x21   : > { %p926_p10 = pnand %p924_p9, %p912_p13  ;;  %p933_p0 = por %p932_p12, %p931_p1 }
  0x23   : > { %p927_p6 = pneg %p926_p10 }
  0x25   : > { %p934_p4 = pnand %p933_p0, %p927_p6 }
  0x27   : > { %937 = shalt.err (!%p934_p4)
}
  0x28   : > { %s1086_s25 = smov 128   ;;  %s1087_s6 = smov 8  }
  0x29   : > { %835 = dma.hbm_to_vmem [thread:$0]  (!%p1188_p11), %s1403_s1, 2048, %s1181_s7, [#allocation6], %s1086_s25, %s1086_s25, %s1087_s6  }
  0x2a   : > { %s938_s14 = scalar_lea.hbm %s1405_s3, 2048 }
  0x2b   : > { %p939_p1 = scmp.ne.s32.totalorder %s1405_s3, %s938_s14  ;;  %p945_p10 = scmp.lt.u32.totalorder %s938_s14, %s1405_s3 }
  0x2d   : > { %p941_p4 = pnand %p939_p1, %p912_p13 }
  0x2f   : > { %p942_p6 = pneg %p941_p4 }
  0x31   : > { %p947_p3 = pnand %p945_p10, %p942_p6 }
  0x33   : > { %950 = shalt.err (!%p947_p3)
}
  0x34   : > { %s951_s7 = scalar_lea.vmem %s1192_s10, 2048  ;;  %p959_p12 = scmp.lt.s32.totalorder %s1192_s10, %s1192_s10 }
  0x35   : > { %p952_p5 = scmp.ne.s32.totalorder %s1192_s10, %s951_s7  ;;  %p960_p0 = scmp.lt.s32.totalorder %s951_s7, %s951_s7 }
  0x37   : > { %p954_p7 = pnand %p952_p5, %p912_p13  ;;  %p961_p1 = por %p960_p0, %p959_p12 }
  0x39   : > { %p955_p9 = pneg %p954_p7 }
  0x3b   : > { %p962_p4 = pnand %p961_p1, %p955_p9 }
  0x3d   : > { %965 = shalt.err (!%p962_p4)
}
  0x3e   : > { %838 = dma.hbm_to_vmem [thread:$0]  (!%p1188_p11), %s1405_s3, 2048, %s1192_s10, [#allocation6], %s1086_s25, %s1086_s25, %s1087_s6  }
  0x3f   : > { %s34_s12 = sadd.s32 1, %s1078_s22  ;;  %s41_s13 = sadd.s32 1, %s1070_s20 }
  0x40   : > { %p36_p13 = scmp.ge.s32.totalorder %s34_s12, 2  ;;  %p48_p6 = scmp.ne.s32.totalorder %s1070_s20, %s1066_s19 }
  0x41   : > { %p49_p10 = scmp.eq.s32.totalorder %s1082_s23, 0  ;;  %p849_p3 = scmp.lt.s32.totalorder %s1082_s23, 2 }
  0x42   : > { %s1431_s12 = smov (%p36_p13, %s34_s12), 0  ;;  %p1256_p7 = por %p1161_p2, %p48_p6 }
  0x43   : > { %p50_p5 = por %p49_p10, %p48_p6  ;;  %s38_s14 = ssub.s32 %s1078_s22, %s1431_s12 }
  0x44   : > { %s1418_s8 = scalar_select %p1256_p7, 1, 0 }
  0x45   : > { %s243_s15 = sand.u32 1, %s1070_s20   ;;  %p39_p9 = scmp.eq.s32.totalorder %s38_s14, 0 }
  0x46   : > { %s655_s10 = sshll.u32 %s243_s15, 3  ;;  %s656_s25 = sshll.u32 %s1078_s22, 7 }
  0x47   : > { %s1265_s6 = scalar_select %p39_p9, %s1070_s20, %s41_s13  }
  0x48   : > { %s1270_s24 = scalar_lea.hbm %s1402_s0, %s656_s25  ;;  %s247_s27 = scalar_lea.vmem [#allocation2], %s655_s10 }
  0x49   : > { %s254_s7 = sshll.u32 %s247_s27, 4  ;;  %p1274_p2 = pnand %p849_p3, %p50_p5  ;;  %s1278_s7 = int_to_ptr.vmem [resolvable:$true] %s254_s7 }
  0x4a   : > { %s244_s11 = scalar_lea.sflag [#allocation3], %s243_s15  ;;  %s966_s13 = scalar_lea.hbm %s1270_s24, 128 }
  0x4b   : > { %p967_p11 = scmp.ne.s32.totalorder %s1270_s24, %s966_s13  ;;  %p968_p12 = pneg %p1274_p2 }
  0x4c   : > { %s971_s25 = scalar_lea.hbm %s1402_s0, 256  ;;  %p972_p4 = scmp.lt.u32.totalorder %s1270_s24, %s1402_s0 }
  0x4d   : > { %p969_p0 = pnand %p968_p12, %p967_p11  ;;  %p973_p13 = scmp.lt.u32.totalorder %s971_s25, %s966_s13 }
  0x4e   : > { %p975_p10 = scmp.lt.u32.totalorder %s966_s13, %s1270_s24 }
  0x4f   : > { %p970_p1 = pneg %p969_p0  ;;  %p974_p6 = por %p973_p13, %p972_p4 }
  0x51   : > { %p976_p3 = por %p975_p10, %p974_p6 }
  0x53   : > { %p977_p5 = pnand %p976_p3, %p970_p1 }
  0x55   : > { %980 = shalt.err (!%p977_p5)
}
  0x56   : > { %s981_s15 = scalar_lea.vmem %s1278_s7, 128  ;;  %s1088_s27 = smov [#allocation2]  }
  0x57   : > { %p982_p9 = scmp.ne.s32.totalorder %s1278_s7, %s981_s15  ;;  %s986_s14 = sshll.u32 %s1088_s27, 4  ;;  %s987_s14 = int_to_ptr.vmem [resolvable:$false] %s986_s14 }
  0x58   : > { %s988_s10 = scalar_lea.vmem %s987_s14, 256  ;;  %p989_p7 = scmp.lt.s32.totalorder %s1278_s7, %s987_s14 }
  0x59   : > { %p984_p11 = pnand %p982_p9, %p968_p12  ;;  %p990_p4 = scmp.lt.s32.totalorder %s988_s10, %s981_s15 }
  0x5b   : > { %p985_p0 = pneg %p984_p11  ;;  %p991_p13 = por %p990_p4, %p989_p7 }
  0x5d   : > { %p992_p6 = pnand %p991_p13, %p985_p0 }
  0x5f   : > { %995 = shalt.err (!%p992_p6)
}
  0x60   : > { %842 = dma.hbm_to_vmem [thread:$0]  (!%p1274_p2), %s1270_s24, 128, %s1278_s7, %s244_s11  }
  0x61   : > { %263 = sbr.rel (%p1177_p8) target bundleno = 610 (0x262), region = 40  ;;  %s1308_s13 = sand.u32 (!%p1177_p8), 1, %s1066_s19  }
  0x62   : > { %s658_s25 = sshll.u32 (!%p1177_p8), %s1308_s13, 3  ;;  %s266_s16 = scalar_lea.sflag (!%p1177_p8), [#allocation3], %s1308_s13 }
  0x63   : > { %s1314_s17 = scalar_lea.vmem (!%p1177_p8), [#allocation2], %s658_s25  ;;  %p1420_p7 = scmp.ne.s32.totalorder (!%p1177_p8), %s1414_s28, 0 }
  0x68   : > { %1049 = dma.done.wait (%p1420_p7), %s266_s16, 128  }
  0x69   : > { %1051 = vsyncadd (%p1420_p7), %s266_s16, 4294967168  ;;  %p1421_p2 = scmp.ne.s32.totalorder %s1412_s26, 0 }
  0x6b   : > { %1053 = dma.done.wait (%p1421_p2), [#allocation6], 4096  }
  0x6c   : > { %1055 = vsyncadd (%p1421_p2), [#allocation6], 4294963200  ;;  %v1089_v0 = vmov 0.0|0.0   ;;  %vm1090_vm0 = vmmov 0   ;;  %v1091_v1 = vmov 0.0   ;;  %v317_v2 = vld [vmem:[#allocation5] sm:$0xff] }
  0x6d   : > { %772 = vmatprep.subr.bf16.mxu0 %v1089_v0  ;;  %734 = vmatprep.mubr.msk.f32.mxu0 %vm1090_vm0, %v1091_v1  ;;  %v318_v3 = vld [vmem:[#allocation5 + $0x8] sm:$0xff]  ;;  %v319_v4 = vld [vmem:[#allocation5 + $0x10] sm:$0xff]  ;;  %v320_v6 = vld [vmem:[#allocation5 + $0x18] sm:$0xff]  ;;  %s665_s7 = sshll.u32 %s1074_s21, 7  ;;  %s306_s9 = scalar_lea.vmem [#allocation8], %s658_s25 }
  0x6e   : > { %796 = vmatprep.subr.bf16.mxu1 %v1089_v0  ;;  %769 = vmatprep.mubr.msk.f32.mxu1 %vm1090_vm0, %v1091_v1  ;;  %v773_v5 = vpack.c.bf16 %v318_v3, %v317_v2  ;;  %v776_v7 = vpack.c.bf16 %v320_v6, %v319_v4  ;;  %v321_v8 = vld [vmem:[#allocation5 + $0x20] sm:$0xff]  ;;  %v322_v9 = vld [vmem:[#allocation5 + $0x28] sm:$0xff]  ;;  %v323_v14 = vld [vmem:[#allocation5 + $0x30] sm:$0xff]  ;;  %s535_s11 = sshll.u32 %s306_s9, 4  ;;  %s1353_s14 = scalar_lea.hbm %s1407_s5, %s665_s7  ;;  %s1355_s11 = int_to_ptr.vmem [resolvable:$true] %s535_s11 }
  0x6f   : > { %v420_v10 = vld [vmem:[#allocation7] sm:$0xff]  ;;  %v421_v11 = vld [vmem:[#allocation7 + $0x8] sm:$0xff]  ;;  %v779_v12 = vpack.c.bf16 %v322_v9, %v321_v8  ;;  %v324_v15 = vld [vmem:[#allocation5 + $0x38] sm:$0xff]  ;;  %s522_s10 = scalar_lea.sflag [#allocation4], %s1308_s13  ;;  %s996_s16 = scalar_lea.vmem %s1355_s11, 128 }
  0x70   : > { %774 = vmatpush3.bf16.msra.mxu0 %v773_v5  ;;  %v797_v13 = vpack.c.bf16 %v421_v11, %v420_v10  ;;  %v782_v16 = vpack.c.bf16 %v324_v15, %v323_v14  ;;  %v325_v17 = vld [vmem:[#allocation5 + $0x40] sm:$0xff]  ;;  %v326_v18 = vld [vmem:[#allocation5 + $0x48] sm:$0xff]  ;;  %v327_v20 = vld [vmem:[#allocation5 + $0x50] sm:$0xff]  ;;  %p997_p8 = scmp.ne.s32.totalorder %s1355_s11, %s996_s16  ;;  %p1422_p12 = scmp.ne.s32.totalorder %s1418_s8, 0 }
  0x71   : > { %775 = vmatprep.subr.bf16.mxu0 %v1089_v0  ;;  %v785_v19 = vpack.c.bf16 %v326_v18, %v325_v17  ;;  %v328_v21 = vld [vmem:[#allocation5 + $0x58] sm:$0xff]  ;;  %v329_v23 = vld [vmem:[#allocation5 + $0x60] sm:$0xff]  ;;  %v330_v24 = vld [vmem:[#allocation5 + $0x68] sm:$0xff]  ;;  %s1092_s21 = smov [#allocation8]  }
  0x72   : > { %798 = vmatpush3.bf16.msra.mxu1 %v797_v13  ;;  %v788_v22 = vpack.c.bf16 %v328_v21, %v327_v20  ;;  %v791_v25 = vpack.c.bf16 %v330_v24, %v329_v23  ;;  %v331_v26 = vld [vmem:[#allocation5 + $0x70] sm:$0xff]  ;;  %v332_v27 = vld [vmem:[#allocation5 + $0x78] sm:$0xff]  ;;  %v424_v33 = vld [vmem:[#allocation7 + $0x20] sm:$0xff]  ;;  %p998_p1 = pnand %p997_p8, %p1422_p12  ;;  %s1000_s25 = sshll.u32 %s1092_s21, 4  ;;  %s1001_s25 = int_to_ptr.vmem [resolvable:$false] %s1000_s25 }
  0x73   : > { %799 = vmatprep.subr.bf16.mxu1 %v1089_v0  ;;  %v794_v28 = vpack.c.bf16 %v332_v27, %v331_v26  ;;  %v316_v29 = vld [vmem:[%s1314_s17] sm:$0xff]  ;;  %v425_v34 = vld [vmem:[#allocation7 + $0x28] sm:$0xff]  ;;  %v428_v39 = vld [vmem:[#allocation7 + $0x40] sm:$0xff]  ;;  %s1002_s17 = scalar_lea.vmem %s1001_s25, 256  ;;  %p1003_p3 = scmp.lt.s32.totalorder %s1355_s11, %s1001_s25 }
  0x74   : > { %777 = vmatpush3.bf16.msra.mxu0 %v776_v7  ;;  %v422_v30 = vld [vmem:[#allocation7 + $0x10] sm:$0xff]  ;;  %v423_v31 = vld [vmem:[#allocation7 + $0x18] sm:$0xff]  ;;  %v803_v35 = vpack.c.bf16 %v425_v34, %v424_v33  ;;  %v429_v40 = vld [vmem:[#allocation7 + $0x48] sm:$0xff]  ;;  %p999_p10 = pneg %p998_p1  ;;  %p1004_p5 = scmp.lt.s32.totalorder %s1002_s17, %s996_s16 }
  0x75   : > { %778 = vmatprep.subr.bf16.mxu0 %v1089_v0  ;;  %v800_v32 = vpack.c.bf16 %v423_v31, %v422_v30  ;;  %v426_v36 = vld [vmem:[#allocation7 + $0x30] sm:$0xff]  ;;  %v427_v37 = vld [vmem:[#allocation7 + $0x38] sm:$0xff]  ;;  %v809_v41 = vpack.c.bf16 %v429_v40, %v428_v39  ;;  %v432_v45 = vld [vmem:[#allocation7 + $0x60] sm:$0xff] }
  0x76   : > { %v806_v38 = vpack.c.bf16 %v427_v37, %v426_v36  ;;  %v430_v42 = vld [vmem:[#allocation7 + $0x50] sm:$0xff]  ;;  %v431_v43 = vld [vmem:[#allocation7 + $0x58] sm:$0xff]  ;;  %v433_v46 = vld [vmem:[#allocation7 + $0x68] sm:$0xff]  ;;  %p1005_p9 = por %p1004_p5, %p1003_p3 }
  0x77   : > { %801 = vmatpush3.bf16.msra.mxu1 %v800_v32  ;;  %v812_v44 = vpack.c.bf16 %v431_v43, %v430_v42  ;;  %v815_v47 = vpack.c.bf16 %v433_v46, %v432_v45  ;;  %v434_v48 = vld [vmem:[#allocation7 + $0x70] sm:$0xff]  ;;  %v435_v49 = vld [vmem:[#allocation7 + $0x78] sm:$0xff] }
  0x78   : > { %780 = vmatpush3.bf16.msra.mxu0 %v779_v12  ;;  %802 = vmatprep.subr.bf16.mxu1 %v1089_v0  ;;  %v818_v50 = vpack.c.bf16 %v435_v49, %v434_v48  ;;  %v662_v51 = vld [vmem:[%s1404_s2] ss:$0 sm:$0xff]  ;;  %p1006_p11 = pnand %p1005_p9, %p999_p10 }
  0x79   : > { %781 = vmatprep.subr.bf16.mxu0 %v1089_v0  ;;  %v663_v1 = vld [vmem:[%s1406_s4] ss:$0 sm:$0xff] }
  0x7b   : > { %804 = vmatpush3.bf16.msra.mxu1 %v803_v35 }
  0x7c   : > { %783 = vmatpush3.bf16.msra.mxu0 %v782_v16  ;;  %805 = vmatprep.subr.bf16.mxu1 %v1089_v0 }
  0x7d   : > { %784 = vmatprep.subr.bf16.mxu0 %v1089_v0 }
  0x7f   : > { %807 = vmatpush3.bf16.msra.mxu1 %v806_v38 }
  0x80   : > { %786 = vmatpush3.bf16.msra.mxu0 %v785_v19  ;;  %808 = vmatprep.subr.bf16.mxu1 %v1089_v0 }
  0x81   : > { %787 = vmatprep.subr.bf16.mxu0 %v1089_v0 }
  0x83   : > { %810 = vmatpush3.bf16.msra.mxu1 %v809_v41 }
  0x84   : > { %789 = vmatpush3.bf16.msra.mxu0 %v788_v22  ;;  %811 = vmatprep.subr.bf16.mxu1 %v1089_v0 }
  0x85   : > { %790 = vmatprep.subr.bf16.mxu0 %v1089_v0 }
  0x87   : > { %813 = vmatpush3.bf16.msra.mxu1 %v812_v44 }
  0x88   : > { %792 = vmatpush3.bf16.msra.mxu0 %v791_v25  ;;  %814 = vmatprep.subr.bf16.mxu1 %v1089_v0 }
  0x89   : > { %793 = vmatprep.subr.bf16.mxu0 %v1089_v0 }
  0x8b   : > { %816 = vmatpush3.bf16.msra.mxu1 %v815_v47 }
  0x8c   : > { %795 = vmatpush3.bf16.msra.mxu0 %v794_v28  ;;  %817 = vmatprep.subr.bf16.mxu1 %v1089_v0 }
  0x8f   : > { %735 = vmatmul.mubr.f32.vlgmr.msra.gmra.mrb[0].mxu0 %v316_v29  ;;  %819 = vmatpush3.bf16.msra.mxu1 %v818_v50 }
 0x162   : > { %v406_v52 = vpop.f32.mrb[0].mxu0 }
 0x163   : > { %v407_v53 = vadd.f32 %v662_v51, %v406_v52  ;;  %v736_v54 = vpop.f32.mrb[1].mxu0 }
 0x165   : > { %v411_v55 = vmul.f32 0.044715, %v407_v53  ;;  %v410_v61 = vmul.f32 0.5, %v407_v53 }
 0x167   : > { %v412_v56 = vmul.f32 %v411_v55, %v407_v53 }
 0x169   : > { %v413_v57 = vmul.f32 %v412_v56, %v407_v53 }
 0x16b   : > { %v414_v58 = vadd.f32 %v413_v57, %v407_v53 }
 0x16d   : > { %v415_v59 = vmul.f32 0.7978846, %v414_v58 }
 0x16f   : > { %908 = vtanh.f32 %v415_v59 }
 0x179   : > { %v909_v60 = vpop.eup %908 }
 0x17a   : > { %v417_v62 = vadd.f32 1.0, %v909_v60 }
 0x17c   : > { %v418_v63 = vmul.f32 %v417_v62, %v410_v61 }
 0x17e   : > { %770 = vmatmul.mubr.f32.vlgmr.msra.gmra.mrb[0].mxu1 %v418_v63 }
 0x251   : > { %v502_v0 = vpop.f32.mrb[0].mxu1 }
 0x252   : > { %v771_v2 = vpop.f32.mrb[1].mxu1  ;;  %v519_v3 = vadd.f32 %v663_v1, %v502_v0 }
 0x254   : > { %520 = vst [vmem:[%s306_s9] sm:$0xff] %v519_v3 }
 0x255   : > { %1009 = shalt.err (!%p1006_p11)
}
 0x256   : > { %s1010_s13 = scalar_lea.hbm %s1353_s14, 128  ;;  %s1014_s30 = scalar_lea.hbm %s1407_s5, 256 }
 0x257   : > { %p1011_p0 = scmp.ne.s32.totalorder %s1353_s14, %s1010_s13  ;;  %p1015_p6 = scmp.lt.u32.totalorder %s1353_s14, %s1407_s5 }
 0x258   : > { %p1016_p7 = scmp.lt.u32.totalorder %s1014_s30, %s1010_s13  ;;  %p1018_p8 = scmp.lt.u32.totalorder %s1010_s13, %s1353_s14 }
 0x259   : > { %p1012_p4 = pnand %p1011_p0, %p1422_p12 }
 0x25a   : > { %p1017_p2 = por %p1016_p7, %p1015_p6 }
 0x25b   : > { %p1013_p13 = pneg %p1012_p4 }
 0x25c   : > { %p1019_p1 = por %p1018_p8, %p1017_p2 }
 0x25e   : > { %p1020_p10 = pnand %p1019_p1, %p1013_p13 }
 0x260   : > { %1023 = shalt.err (!%p1020_p10)
}
 0x261   : > { %830 = dma.vmem_to_hbm [thread:$0]  (%p1422_p12), %s1355_s11, 128, %s1353_s14, %s522_s10  }
 0x262 PF: > { %s547_s9 = sand.u32 1, %s1062_s18   ;;  %p1423_p3 = scmp.ne.s32.totalorder %s1415_s29, 0 }
 0x263   : > { %p1424_p5 = scmp.ge.s32.totalorder %s1082_s23, 2  ;;  %s548_s15 = scalar_lea.sflag [#allocation4], %s547_s9 }
 0x265   : > { %p844_p9 = pnand %p1424_p5, %p1423_p3 }
 0x267   : > { %1057 = dma.done.wait (!%p844_p9), %s548_s15, 128  }
 0x268   : > { %1059 = vsyncadd (!%p844_p9), %s548_s15, 4294967168  ;;  %s22_s23 = sadd.s32 1, %s1082_s23   ;;  %s1425_s18 = smov %s1066_s19 }
 0x269   : > { %p19_p11 = scmp.ge.s32.totalorder %s22_s23, 4   ;;  %s1426_s19 = smov %s1070_s20 }
 0x26a   : > { %s1427_s20 = smov %s1265_s6  ;;  %s1428_s21 = smov %s1078_s22 }
 0x26b   : > { %s1429_s22 = smov %s1431_s12  ;;  %21 = sbr.rel (!%p19_p11) target bundleno = 7 (0x7), region = 106 }
 0x272   :  { %553 = vsyncpa [#allocation3], 1 }
 0x273   :  { %555 = vsyncpa [#allocation3 + $0x1], 1 }
 0x274   :  { %556 = vsyncpa [#allocation6], 1 }
 0x275   :  { %557 = vsyncpa [#allocation4], 1 }
 0x276   :  { %559 = vsyncpa [#allocation4 + $0x1], 1 }

</bundles_post_ra>
